<compile_context>
chip_gen: v7x
topology: tpu7x:2x2x1
jax: 0.10.0
libtpu: 0.0.40
codegen_flags: <defaults>
</compile_context>

<pallas_src>
import jax
import jax.numpy as jnp
from jax.experimental import pallas as pl
from jax.experimental.pallas import tpu as pltpu


def _round_up(x, m):
    return ((x + m - 1) // m) * m


def _cdiv(a, b):
    return -(-a // b)


def _pick_toh(OH, W2, L, Cout_p, halo_h, n_shifts):
    """Output-row-block size: as many coarse rows as fit a conservative VMEM budget."""
    w_bytes = 2 * n_shifts * L * Cout_p * 2              # resident (dbl-buffered) weights
    budget = max(4 << 20, (36 << 20) - w_bytes)          # keep total well under 48 MiB

    def step_bytes(toh):
        tm = toh * W2
        return (2 * (toh + halo_h) * W2 * L * 2          # bf16 input window, x2 buffers
                + 2 * tm * Cout_p * 2                    # bf16 output tile,  x2 buffers
                + tm * Cout_p * 4)                       # f32 accumulator scratch

    toh = max(1, min(OH, _cdiv(4096, W2)))               # aim for ~4096 wide rows / tile
    while toh > 1 and step_bytes(toh) > budget:
        toh -= 1
    if toh > 1:
        toh -= toh % 2                                   # even -> TM multiple of 16
    return max(1, toh)


def conv2pad_forward(x, weight, bias, stride, padding):
    """Forward pass of Conv2Pad: Conv2d(...)(F.pad(x, [0,1,0,1])).

    x      : (N, Cin, H, W)      NCHW (PyTorch convention)
    weight : (Cout, Cin, KH, KW) OIHW
    bias   : (Cout,)
    returns: (N, Cout, OH, OW)   NCHW, x.dtype
    """
    N, Cin, H, W = x.shape
    Cout, _, KH, KW = weight.shape
    S, P = int(stride), int(padding)
    out_dtype = x.dtype

    # F.pad(x, [0,1,0,1]) -> +1 right on W, +1 bottom on H, then conv's own pad P.
    Hp, Wp = H + 2 * P + 1, W + 2 * P + 1
    OH = (Hp - KH) // S + 1
    OW = (Wp - KW) // S + 1

    # Stride-phase (space-to-depth) decomposition.  Padded pixel (h, w) lives at phase
    # (h % S, w % S), coarse position (h // S, w // S).  For tap (kh, kw) and output
    # (oh, ow): phase = (kh % S, kw % S), coarse = (oh + kh//S, ow + kw//S).  Folding
    # (phase, channel) into the lane dim makes the LHS for each coarse shift
    # (kh//S, kw//S) a contiguous, statically-offset slice of the flattened slab.
    oh_off_max = (KH - 1) // S
    ow_off_max = (KW - 1) // S
    n_sh_h, n_sh_w = oh_off_max + 1, ow_off_max + 1
    n_shifts = n_sh_h * n_sh_w
    halo_h = oh_off_max + (1 if ow_off_max > 0 else 0)   # extra coarse rows per tile

    # "Wide" width: compute all W2 coarse columns per output row, slice to OW later.
    W2 = _round_up(max(OW + ow_off_max, _cdiv(Wp, S)), 8)
    L = S * S * Cin                                      # folded contraction (lane) dim
    Cout_p = _round_up(max(Cout, 128), 128)              # lane-dense output channels

    TOH = _pick_toh(OH, W2, L, Cout_p, halo_h, n_shifts)
    T = _cdiv(OH, TOH)                                   # output-row tiles per image
    TIN = TOH + halo_h                                   # input coarse rows per tile
    TM = TOH * W2                                        # "wide" output rows per tile

    H2 = max(T * TOH + halo_h, _cdiv(Hp, S))             # coarse rows in the slab
    Hpad, Wpad = H2 * S, W2 * S

    # All per-tap reads stay inside the tile window.
    assert oh_off_max * W2 + ow_off_max + TM <= TIN * W2
    assert H2 >= T * TOH + halo_h

    # ---- wrapper-side layout: one relayout pass + cheap halo windowing -------------
    # TODO(synk): accepting channels-last input (or allow_input_fusion) would remove
    # this extra HBM round trip entirely for memory-bound layers.
    xb = x.astype(jnp.bfloat16)
    xp = jnp.pad(xb, ((0, 0), (0, 0), (P, Hpad - H - P), (P, Wpad - W - P)))
    x_r = xp.reshape(N, Cin, H2, S, W2, S)               # (n, c, h2, ph, w2, pw)
    x_r = x_r.transpose(0, 2, 4, 3, 5, 1)                # (n, h2, w2, ph, pw, c)
    x_r = x_r.reshape(N, H2, W2, L)
    # Per-tile windows with halo_h rows of overlap -> plain Blocked specs in the grid.
    x_win = jnp.stack([x_r[:, t * TOH: t * TOH + TIN] for t in range(T)], axis=1)
    x_win = x_win.reshape(N, T, TIN * W2, L)

    # Per-shift weight matrices: W_d[(ph*S+pw)*Cin + c, co] = weight[co, c, kh, kw]
    # with kh = oh_off*S + ph, kw = ow_off*S + pw (zero when the tap is outside KHxKW).
    w_t = weight.transpose(2, 3, 1, 0)                   # (KH, KW, Cin, Cout)
    zero_tap = jnp.zeros((Cin, Cout), weight.dtype)
    shift_mats, shift_offsets = [], []
    for oh_off in range(n_sh_h):
        for ow_off in range(n_sh_w):
            taps = []
            for ph in range(S):
                for pw in range(S):
                    kh, kw = oh_off * S + ph, ow_off * S + pw
                    taps.append(w_t[kh, kw] if (kh < KH and kw < KW) else zero_tap)
            shift_mats.append(jnp.concatenate(taps, axis=0))        # (L, Cout)
            shift_offsets.append(oh_off * W2 + ow_off)              # static row shift
    w_r = jnp.stack(shift_mats, axis=0)                              # (n_shifts, L, Cout)
    w_r = jnp.pad(w_r, ((0, 0), (0, 0), (0, Cout_p - Cout))).astype(jnp.bfloat16)
    b_r = jnp.pad(bias.astype(jnp.float32), (0, Cout_p - Cout)).reshape(1, Cout_p)
    shift_offsets = tuple(shift_offsets)

    def kernel(x_ref, w_ref, b_ref, o_ref, acc_ref):
        # x_ref  : (TIN*W2, L)           bf16  phase-folded activation window
        # w_ref  : (n_shifts, L, Cout_p) bf16  per-shift weight matrices
        # b_ref  : (1, Cout_p)           f32
        # o_ref  : (TM, Cout_p)          bf16  wide output rows for this tile
        # acc_ref: (TM, Cout_p)          f32   VMEM accumulator (bias-initialised)
        acc_ref[...] = jnp.broadcast_to(b_ref[...], acc_ref.shape)
        for i, d in enumerate(shift_offsets):            # static unroll: <= KH*KW dots
            acc_ref[...] += jnp.dot(x_ref[pl.ds(d, TM), :], w_ref[i],
                                    preferred_element_type=jnp.float32)
        o_ref[...] = acc_ref[...].astype(o_ref.dtype)

    flops = 2 * N * T * TM * L * Cout_p * n_shifts
    bytes_accessed = (x_win.size * 2 + w_r.size * 2 + b_r.size * 4
                      + N * T * TM * Cout_p * 2)

    out_wide = pl.pallas_call(
        kernel,
        out_shape=jax.ShapeDtypeStruct((N, T, TM, Cout_p), jnp.bfloat16),
        grid_spec=pltpu.PrefetchScalarGridSpec(
            num_scalar_prefetch=0,
            grid=(N, T),
            in_specs=[
                pl.BlockSpec((None, None, TIN * W2, L), lambda n, t: (n, t, 0, 0)),
                # constant index_maps -> weight / bias blocks stay resident
                pl.BlockSpec((n_shifts, L, Cout_p), lambda n, t: (0, 0, 0)),
                pl.BlockSpec((1, Cout_p), lambda n, t: (0, 0)),
            ],
            out_specs=pl.BlockSpec((None, None, TM, Cout_p),
                                   lambda n, t: (n, t, 0, 0)),
            scratch_shapes=[pltpu.VMEM((TM, Cout_p), jnp.float32)],
        ),
        compiler_params=pltpu.CompilerParams(
            # both axes independent -> shards across v7x's 2 TensorCores even at N=1
            dimension_semantics=("parallel", "parallel"),
            vmem_limit_bytes=48 * 1024 * 1024,
        ),
        cost_estimate=pl.CostEstimate(
            flops=flops, transcendentals=0, bytes_accessed=bytes_accessed),
    )(x_win, w_r, b_r)

    # Drop padded rows / wide columns / padded channels, back to NCHW for parity.
    out = out_wide.reshape(N, T * TOH, W2, Cout_p)[:, :OH, :OW, :Cout]
    return out.transpose(0, 3, 1, 2).astype(out_dtype)


if __name__ == "__main__":
    # Conv2Pad(in_channels=4, out_channels=8, kernel_size=3, stride=2, padding=0)
    # — the downsample configuration used in the SD encoder, at small test shapes.
    N, Cin, H, W = 2, 4, 16, 16
    Cout, KH, KW = 8, 3, 3
    stride, padding = 2, 0

    key = jax.random.PRNGKey(0)
    kx, kwt, kb = jax.random.split(key, 3)

    x = jax.random.normal(kx, (N, Cin, H, W), dtype=jnp.float32)

    fan_in = Cin * KH * KW
    bound = 1.0 / float(fan_in) ** 0.5
    weight = jax.random.uniform(kwt, (Cout, Cin, KH, KW), jnp.float32, -bound, bound)
    bias = jax.random.uniform(kb, (Cout,), jnp.float32, -bound, bound)

    y = conv2pad_forward(x, weight, bias, stride, padding)
    y = jax.block_until_ready(y)

    # Reference: F.pad([0,1,0,1]) then VALID conv, full f32 precision.
    xpad = jnp.pad(x, ((0, 0), (0, 0), (padding, padding + 1), (padding, padding + 1)))
    y_ref = jax.lax.conv_general_dilated(
        xpad, weight, window_strides=(stride, stride), padding="VALID",
        dimension_numbers=("NCHW", "OIHW", "NCHW"),
        precision=jax.lax.Precision.HIGHEST) + bias.reshape(1, -1, 1, 1)

    OH = (H + 1 - KH) // stride + 1
    OW = (W + 1 - KW) // stride + 1
    assert y.shape == (N, Cout, OH, OW), y.shape
    # bf16 MXU inputs + bf16 kernel output -> loosened tolerance vs the f32 reference.
    assert jnp.allclose(y, y_ref, atol=5e-2, rtol=5e-2), \
        float(jnp.max(jnp.abs(y - y_ref)))

    print("KERNEL_OK")
</pallas_src>

<mosaic_0001>
module attributes {stable_mosaic.version = 11 : i64} {
  func.func @kernel(%arg0: i32, %arg1: i32, %arg2: memref<1x1x160x16xbf16, #tpu.memory_space<vmem>>, %arg3: memref<4x16x128xbf16, #tpu.memory_space<vmem>>, %arg4: memref<1x128xf32, #tpu.memory_space<vmem>>, %arg5: memref<1x1x128x128xbf16, #tpu.memory_space<vmem>>, %arg6: memref<128x128xf32, #tpu.memory_space<vmem>>) attributes {dimension_semantics = [#tpu.dimension_semantics<parallel>, #tpu.dimension_semantics<parallel>], iteration_bounds = array<i64: 2, 1>, scalar_prefetch = 0 : i64, scratch_operands = 1 : i64, tpu.core_type = #tpu.core_type<tc>, window_params = [{transform_indices = @transform_0, window_bounds = array<i64: 1, 1, 160, 16>}, {pipeline_mode = #tpu.pipeline_mode<synchronous>, transform_indices = @transform_1, window_bounds = array<i64: 4, 16, 128>}, {pipeline_mode = #tpu.pipeline_mode<synchronous>, transform_indices = @transform_2, window_bounds = array<i64: 1, 128>}, {transform_indices = @transform_3, window_bounds = array<i64: 1, 1, 128, 128>}]} {
    %c0 = arith.constant 0 : index
    %c0_0 = arith.constant 0 : index
    %0 = vector.load %arg4[%c0, %c0_0] : memref<1x128xf32, #tpu.memory_space<vmem>>, vector<1x128xf32>
    %1 = vector.shape_cast %0 : vector<1x128xf32> to vector<1x128xf32>
    %2 = vector.broadcast %1 : vector<1x128xf32> to vector<128x128xf32>
    %c0_1 = arith.constant 0 : index
    %c0_2 = arith.constant 0 : index
    %3 = vector.load %arg6[%c0_1, %c0_2] : memref<128x128xf32, #tpu.memory_space<vmem>>, vector<128x128xf32>
    tpu.vector_store %arg6[%c0_1, %c0_2], %2 {strides = array<i32>} : memref<128x128xf32, #tpu.memory_space<vmem>>, vector<128x128xf32>,
    %c0_3 = arith.constant 0 : index
    %c0_4 = arith.constant 0 : index
    %4 = vector.load %arg6[%c0_3, %c0_4] : memref<128x128xf32, #tpu.memory_space<vmem>>, vector<128x128xf32>
    %c0_5 = arith.constant 0 : index
    %c0_6 = arith.constant 0 : index
    %c0_7 = arith.constant 0 : index
    %c0_8 = arith.constant 0 : index
    %5 = vector.load %arg2[%c0_5, %c0_6, %c0_7, %c0_8] : memref<1x1x160x16xbf16, #tpu.memory_space<vmem>>, vector<1x1x128x16xbf16>
    %6 = vector.shape_cast %5 : vector<1x1x128x16xbf16> to vector<128x16xbf16>
    %c0_9 = arith.constant 0 : index
    %c0_10 = arith.constant 0 : index
    %c0_11 = arith.constant 0 : index
    %7 = vector.load %arg3[%c0_9, %c0_10, %c0_11] : memref<4x16x128xbf16, #tpu.memory_space<vmem>>, vector<1x16x128xbf16>
    %8 = vector.shape_cast %7 : vector<1x16x128xbf16> to vector<16x128xbf16>
    %cst = arith.constant dense<0.000000e+00> : vector<128x128xf32>
    %9 = tpu.matmul %6, %8, %cst {dimension_numbers = #tpu.dot_dimension_numbers<[1], [0], [0], [1], [0, 0, 1, 1], [], []>} : vector<128x16xbf16>, vector<16x128xbf16>, vector<128x128xf32> -> vector<128x128xf32>
    %10 = arith.addf %4, %9 : vector<128x128xf32>
    %c0_12 = arith.constant 0 : index
    %c0_13 = arith.constant 0 : index
    %11 = vector.load %arg6[%c0_12, %c0_13] : memref<128x128xf32, #tpu.memory_space<vmem>>, vector<128x128xf32>
    tpu.vector_store %arg6[%c0_12, %c0_13], %10 {strides = array<i32>} : memref<128x128xf32, #tpu.memory_space<vmem>>, vector<128x128xf32>,
    %c0_14 = arith.constant 0 : index
    %c0_15 = arith.constant 0 : index
    %12 = vector.load %arg6[%c0_14, %c0_15] : memref<128x128xf32, #tpu.memory_space<vmem>>, vector<128x128xf32>
    %c0_16 = arith.constant 0 : index
    %c0_17 = arith.constant 0 : index
    %c1 = arith.constant 1 : index
    %c0_18 = arith.constant 0 : index
    %13 = vector.load %arg2[%c0_16, %c0_17, %c1, %c0_18] : memref<1x1x160x16xbf16, #tpu.memory_space<vmem>>, vector<1x1x128x16xbf16>
    %14 = vector.shape_cast %13 : vector<1x1x128x16xbf16> to vector<128x16xbf16>
    %c1_19 = arith.constant 1 : index
    %c0_20 = arith.constant 0 : index
    %c0_21 = arith.constant 0 : index
    %15 = vector.load %arg3[%c1_19, %c0_20, %c0_21] : memref<4x16x128xbf16, #tpu.memory_space<vmem>>, vector<1x16x128xbf16>
    %16 = vector.shape_cast %15 : vector<1x16x128xbf16> to vector<16x128xbf16>
    %cst_22 = arith.constant dense<0.000000e+00> : vector<128x128xf32>
    %17 = tpu.matmul %14, %16, %cst_22 {dimension_numbers = #tpu.dot_dimension_numbers<[1], [0], [0], [1], [0, 0, 1, 1], [], []>} : vector<128x16xbf16>, vector<16x128xbf16>, vector<128x128xf32> -> vector<128x128xf32>
    %18 = arith.addf %12, %17 : vector<128x128xf32>
    %c0_23 = arith.constant 0 : index
    %c0_24 = arith.constant 0 : index
    %19 = vector.load %arg6[%c0_23, %c0_24] : memref<128x128xf32, #tpu.memory_space<vmem>>, vector<128x128xf32>
    tpu.vector_store %arg6[%c0_23, %c0_24], %18 {strides = array<i32>} : memref<128x128xf32, #tpu.memory_space<vmem>>, vector<128x128xf32>,
    %c0_25 = arith.constant 0 : index
    %c0_26 = arith.constant 0 : index
    %20 = vector.load %arg6[%c0_25, %c0_26] : memref<128x128xf32, #tpu.memory_space<vmem>>, vector<128x128xf32>
    %c0_27 = arith.constant 0 : index
    %c0_28 = arith.constant 0 : index
    %c16 = arith.constant 16 : index
    %c0_29 = arith.constant 0 : index
    %21 = vector.load %arg2[%c0_27, %c0_28, %c16, %c0_29] : memref<1x1x160x16xbf16, #tpu.memory_space<vmem>>, vector<1x1x128x16xbf16>
    %22 = vector.shape_cast %21 : vector<1x1x128x16xbf16> to vector<128x16xbf16>
    %c2 = arith.constant 2 : index
    %c0_30 = arith.constant 0 : index
    %c0_31 = arith.constant 0 : index
    %23 = vector.load %arg3[%c2, %c0_30, %c0_31] : memref<4x16x128xbf16, #tpu.memory_space<vmem>>, vector<1x16x128xbf16>
    %24 = vector.shape_cast %23 : vector<1x16x128xbf16> to vector<16x128xbf16>
    %cst_32 = arith.constant dense<0.000000e+00> : vector<128x128xf32>
    %25 = tpu.matmul %22, %24, %cst_32 {dimension_numbers = #tpu.dot_dimension_numbers<[1], [0], [0], [1], [0, 0, 1, 1], [], []>} : vector<128x16xbf16>, vector<16x128xbf16>, vector<128x128xf32> -> vector<128x128xf32>
    %26 = arith.addf %20, %25 : vector<128x128xf32>
    %c0_33 = arith.constant 0 : index
    %c0_34 = arith.constant 0 : index
    %27 = vector.load %arg6[%c0_33, %c0_34] : memref<128x128xf32, #tpu.memory_space<vmem>>, vector<128x128xf32>
    tpu.vector_store %arg6[%c0_33, %c0_34], %26 {strides = array<i32>} : memref<128x128xf32, #tpu.memory_space<vmem>>, vector<128x128xf32>,
    %c0_35 = arith.constant 0 : index
    %c0_36 = arith.constant 0 : index
    %28 = vector.load %arg6[%c0_35, %c0_36] : memref<128x128xf32, #tpu.memory_space<vmem>>, vector<128x128xf32>
    %c0_37 = arith.constant 0 : index
    %c0_38 = arith.constant 0 : index
    %c17 = arith.constant 17 : index
    %c0_39 = arith.constant 0 : index
    %29 = vector.load %arg2[%c0_37, %c0_38, %c17, %c0_39] : memref<1x1x160x16xbf16, #tpu.memory_space<vmem>>, vector<1x1x128x16xbf16>
    %30 = vector.shape_cast %29 : vector<1x1x128x16xbf16> to vector<128x16xbf16>
    %c3 = arith.constant 3 : index
    %c0_40 = arith.constant 0 : index
    %c0_41 = arith.constant 0 : index
    %31 = vector.load %arg3[%c3, %c0_40, %c0_41] : memref<4x16x128xbf16, #tpu.memory_space<vmem>>, vector<1x16x128xbf16>
    %32 = vector.shape_cast %31 : vector<1x16x128xbf16> to vector<16x128xbf16>
    %cst_42 = arith.constant dense<0.000000e+00> : vector<128x128xf32>
    %33 = tpu.matmul %30, %32, %cst_42 {dimension_numbers = #tpu.dot_dimension_numbers<[1], [0], [0], [1], [0, 0, 1, 1], [], []>} : vector<128x16xbf16>, vector<16x128xbf16>, vector<128x128xf32> -> vector<128x128xf32>
    %34 = arith.addf %28, %33 : vector<128x128xf32>
    %c0_43 = arith.constant 0 : index
    %c0_44 = arith.constant 0 : index
    %35 = vector.load %arg6[%c0_43, %c0_44] : memref<128x128xf32, #tpu.memory_space<vmem>>, vector<128x128xf32>
    tpu.vector_store %arg6[%c0_43, %c0_44], %34 {strides = array<i32>} : memref<128x128xf32, #tpu.memory_space<vmem>>, vector<128x128xf32>,
    %c0_45 = arith.constant 0 : index
    %c0_46 = arith.constant 0 : index
    %36 = vector.load %arg6[%c0_45, %c0_46] : memref<128x128xf32, #tpu.memory_space<vmem>>, vector<128x128xf32>
    %37 = arith.truncf %36 : vector<128x128xf32> to vector<128x128xbf16>
    %c0_47 = arith.constant 0 : index
    %c0_48 = arith.constant 0 : index
    %c0_49 = arith.constant 0 : index
    %c0_50 = arith.constant 0 : index
    %38 = vector.load %arg5[%c0_47, %c0_48, %c0_49, %c0_50] : memref<1x1x128x128xbf16, #tpu.memory_space<vmem>>, vector<1x1x128x128xbf16>
    %39 = vector.shape_cast %38 : vector<1x1x128x128xbf16> to vector<128x128xbf16>
    %40 = vector.shape_cast %37 : vector<128x128xbf16> to vector<1x1x128x128xbf16>
    tpu.vector_store %arg5[%c0_47, %c0_48, %c0_49, %c0_50], %40 {strides = array<i32>} : memref<1x1x128x128xbf16, #tpu.memory_space<vmem>>, vector<1x1x128x128xbf16>,
    return
  }
  func.func @transform_0(%arg0: i32, %arg1: i32) -> (i32, i32, i32, i32) {
    %c0_i32 = arith.constant 0 : i32
    %c0_i32_0 = arith.constant 0 : i32
    %c0_i32_1 = arith.constant 0 : i32
    return %arg0, %arg1, %c0_i32, %c0_i32_0 : i32, i32, i32, i32
  }
  func.func @transform_1(%arg0: i32, %arg1: i32) -> (i32, i32, i32) {
    %c0_i32 = arith.constant 0 : i32
    %c0_i32_0 = arith.constant 0 : i32
    %c0_i32_1 = arith.constant 0 : i32
    %c0_i32_2 = arith.constant 0 : i32
    return %c0_i32, %c0_i32_0, %c0_i32_1 : i32, i32, i32
  }
  func.func @transform_2(%arg0: i32, %arg1: i32) -> (i32, i32) {
    %c0_i32 = arith.constant 0 : i32
    %c0_i32_0 = arith.constant 0 : i32
    %c0_i32_1 = arith.constant 0 : i32
    return %c0_i32, %c0_i32_0 : i32, i32
  }
  func.func @transform_3(%arg0: i32, %arg1: i32) -> (i32, i32, i32, i32) {
    %c0_i32 = arith.constant 0 : i32
    %c0_i32_0 = arith.constant 0 : i32
    %c0_i32_1 = arith.constant 0 : i32
    return %arg0, %arg1, %c0_i32, %c0_i32_0 : i32, i32, i32, i32
  }
}

</mosaic_0001>

<bundles_post_ra>
// kernel: tpu_custom_call.1
= control target key start
LH: loop header
LB: loop body
LE: loop exit
PB: predicated region body
PF: predicated region fallthrough
CT: control target
= control target key end

     0   :  { %8 = vsyncpa [#allocation4], 0  ;;  %s2283_s0 = inlined_call_operand.vmem [shape: bf16[2,1,160,16], index: 0, kind: input, shape index: {}]   ;;  %s2284_s1 = inlined_call_operand.vmem [shape: bf16[4,16,128], index: 1, kind: input, shape index: {}]   ;;  %s2285_s2 = inlined_call_operand.vmem [shape: f32[1,128], index: 2, kind: input, shape index: {}]   ;;  %s2286_s3 = inlined_call_operand.hbm [shape: bf16[2,1,128,128], index: 3, kind: output, shape index: {}]  }
   0x1   :  { %10 = vsyncpa [#allocation4 + $0x1], 0  ;;  %s2036_s12 = smov 0   ;;  %s2038_s13 = smov 0  }
   0x2   :  { %s2040_s14 = smov 0   ;;  %s2042_s15 = smov 0  }
   0x3   :  { %s2044_s16 = smov 0   ;;  %s2046_s17 = smov 0  }
   0x4 LB: > { %s1496_s18 = sadd.s32 4294967295, %s2011_s17   ;;  %s1497_s19 = sadd.s32 4294967294, %s2011_s17   ;;  %s2011_s17 = sphi %s2046_s17, %s16_s17   ;;  %s2007_s16 = sphi %s2044_s16, %s2293_s16   ;;  %s2003_s15 = sphi %s2042_s15, %s2292_s15   ;;  %s1999_s14 = sphi %s2040_s14, %s2291_s14   ;;  %s1995_s13 = sphi %s2038_s13, %s2290_s13   ;;  %s1991_s12 = sphi %s2036_s12, %s2289_s12  }
   0x5   : > { %s28_s20 = sadd.s32 1, %s2007_s16  ;;  %s107_s21 = sadd.s32 1, %s1999_s14 }
   0x6   : > { %p30_p0 = scmp.ge.s32.totalorder %s28_s20, 2  ;;  %p117_p1 = scmp.ne.s32.totalorder %s1999_s14, %s1995_s13 }
   0x7   : > { %p118_p2 = scmp.eq.s32.totalorder %s1496_s18, 1  ;;  %p123_p3 = scmp.ne.s32.totalorder %s1995_s13, %s1991_s12 }
   0x8   : > { %s2295_s20 = smov (%p30_p0, %s28_s20), 0  ;;  %p124_p5 = scmp.eq.s32.totalorder %s1497_s19, 1 }
   0x9   : > { %p2076_p4 = por %p118_p2, %p117_p1  ;;  %s102_s23 = ssub.s32 %s2007_s16, %s2295_s20 }
   0xa   : > { %p1500_p6 = scmp.ge.s32.totalorder %s2011_s17, 1  ;;  %p105_p7 = scmp.eq.s32.totalorder %s102_s23, 0 }
   0xb   : > { %p2083_p8 = por %p124_p5, %p123_p3  ;;  %p160_p9 = scmp.lt.s32.totalorder %s2011_s17, 3 }
   0xc   : > { %s2089_s25 = scalar_select %p105_p7, %s1999_s14, %s107_s21  }
   0xd   : > { %p161_p10 = pnand %p1500_p6, %p160_p9 }
   0xe   : > { %v1895_v0 = vld [vmem:[%s2284_s1] sm:$0xff] (!%p161_p10)   ;;  %p188_p11 = scmp.lt.s32.totalorder (!%p161_p10), %s2003_s15, 1  ;;  %v1896_v1 = vld [vmem:[%s2284_s1 + $0x10] sm:$0xff] (!%p161_p10)   ;;  %v1898_v2 = vld [vmem:[%s2284_s1 + $0x8] sm:$0xff] (!%p161_p10)   ;;  %vm301_vm0 = vcmask (!%p161_p10), 130048   ;;  %s185_s21 = sand.u32 (!%p161_p10), 1, %s1995_s13  }
   0xf   : > { %164 = sbr.rel (%p161_p10) target bundleno = 321 (0x141), region = 32  ;;  %1701 = vmatprep.subr.bf16.mxu1 (!%p161_p10), %v1895_v0  ;;  %1737 = vmatprep.subr.bf16.mxu0 (!%p161_p10), %v1896_v1  ;;  %v1902_v3 = vld [vmem:[%s2284_s1 + $0x18] sm:$0xff] (!%p161_p10)   ;;  %vm534_vm1 = vsmask.f32 (!%p161_p10), 7424  ;;  %s1501_s23 = sshll.u32 (!%p161_p10), %s185_s21, 6 }
  0x10   : > { %1702 = vmatpush3.bf16.msra.mxu1 (!%p161_p10), %v1895_v0  ;;  %1738 = vmatpush3.bf16.msra.mxu0 (!%p161_p10), %v1896_v1  ;;  %s2204_s26 = scalar_lea.vmem (!%p161_p10), [#allocation3], %s1501_s23  ;;  %s1617_s27 = sshll.u32 (!%p161_p10), %s2003_s15, 10 }
  0x11   : > { %1719 = vmatprep.subr.bf16.mxu1 (!%p161_p10), %v1898_v2  ;;  %1755 = vmatprep.subr.bf16.mxu0 (!%p161_p10), %v1902_v3  ;;  %s1414_s28 = sshll.u32 (!%p161_p10), %s2204_s26, 4  ;;  %s2229_s4 = scalar_lea.hbm (!%p161_p10), %s2286_s3, %s1617_s27  ;;  %s2231_s28 = int_to_ptr.vmem [resolvable:$true] %s1414_s28 }
  0x12   : > { %s2237_s5 = scalar_lea.sflag (!%p161_p10), [#allocation4], %s185_s21  ;;  %s2013_s6 = smov (!%p161_p10), [#allocation3]  }
  0x13   : > { %s1937_s7 = sshll.u32 (!%p161_p10), %s2013_s6, 4  ;;  %s1938_s7 = int_to_ptr.vmem [resolvable:$false] %s1937_s7 }
  0x14   : > { %p1940_p1 = scmp.lt.s32.totalorder (!%p161_p10), %s2231_s28, %s1938_s7 }
  0x16   : > { %s189_s30 = scalar_select %p188_p11, %s2003_s15, 1 }
  0x17   : > { %s1933_s15 = scalar_lea.vmem %s2231_s28, 1024 }
  0x18   : > { %s1837_s8 = smul.u32 80, %s189_s30  ;;  %p1934_p12 = scmp.ne.s32.totalorder %s2231_s28, %s1933_s15 }
  0x1a   : > { %s2108_s11 = scalar_lea.vmem %s2283_s0, %s1837_s8  ;;  %p1935_p13 = pnand %p1934_p12, %p2076_p4 }
  0x1b   : > { %v1897_v4 = vld [vmem:[%s2108_s11] sm:$0xff]   ;;  %v1899_v5 = vld [vmem:[%s2108_s11 + $0x8] sm:$0xff]   ;;  %v1901_v7 = vld [vmem:[%s2108_s11 + $0x10] sm:$0xff]   ;;  %s1939_s8 = scalar_lea.vmem %s1938_s7, 2048 }
  0x1c   : > { %1703 = vmatprep.mubr.msk.bf16.mxu1 %vm301_vm0, %v1897_v4  ;;  %v1900_v6 = vld [vmem:[%s2108_s11 + $0x8] sm:$0xff]   ;;  %1739 = vmatprep.mubr.msk.bf16.mxu0 %vm301_vm0, %v1899_v5  ;;  %v1903_v8 = vld [vmem:[%s2108_s11 + $0x10] sm:$0xff]   ;;  %v1904_v9 = vld [vmem:[%s2108_s11 + $0x18] sm:$0xff]   ;;  %p1936_p0 = pneg %p1935_p13  ;;  %p1941_p2 = scmp.lt.s32.totalorder %s1939_s8, %s1933_s15 }
  0x1d   : > { %1704 = vmatmul.mubr.msk.bf16.vlgmr.msra.gmra.mrb[0].mxu1 %vm301_vm0, %v1900_v6  ;;  %1740 = vmatmul.mubr.msk.bf16.vlgmr.msra.gmra.mrb[0].mxu0 %vm301_vm0, %v1901_v7  ;;  %v1905_v10 = vld [vmem:[%s2108_s11 + $0x18] sm:$0xff]   ;;  %v1906_v11 = vld [vmem:[%s2108_s11 + $0x20] sm:$0xff]   ;;  %v1908_v13 = vld [vmem:[%s2108_s11 + $0x28] sm:$0xff]  }
  0x1e   : > { %1720 = vmatpush3.bf16.msra.mxu1 %v1898_v2  ;;  %1756 = vmatpush3.bf16.msra.mxu0 %v1902_v3  ;;  %v1907_v12 = vld [vmem:[%s2108_s11 + $0x20] sm:$0xff]   ;;  %v1909_v14 = vld [vmem:[%s2108_s11 + $0x28] sm:$0xff]   ;;  %v1910_v15 = vld [vmem:[%s2108_s11 + $0x30] sm:$0xff]   ;;  %p1942_p3 = por %p1941_p2, %p1940_p1 }
  0x1f   : > { %1707 = vmatprep.mubr.msk.bf16.mxu1 %vm301_vm0, %v1903_v8  ;;  %1743 = vmatprep.mubr.msk.bf16.mxu0 %vm301_vm0, %v1904_v9  ;;  %v1911_v16 = vld [vmem:[%s2108_s11 + $0x30] sm:$0xff]   ;;  %v1912_v17 = vld [vmem:[%s2108_s11 + $0x38] sm:$0xff]   ;;  %v1915_v18 = vld [vmem:[%s2108_s11] sm:$0xff]  }
  0x20   : > { %v1916_v19 = vld [vmem:[%s2108_s11 + $0x8] sm:$0xff]   ;;  %v536_v20 = vshrl.u32 %v1915_v18, 16  ;;  %v538_v21 = vshll.u32 %v1915_v18, 16  ;;  %v1918_v24 = vld [vmem:[%s2108_s11 + $0x10] sm:$0xff]   ;;  %v1920_v27 = vld [vmem:[%s2108_s11 + $0x18] sm:$0xff]   ;;  %p1943_p5 = pnand %p1942_p3, %p1936_p0 }
  0x21   : > { %v543_v22 = vshll.u32 %v1916_v19, 16  ;;  %v1917_v23 = vld [vmem:[%s2108_s11 + $0x8] sm:$0xff]   ;;  %v1919_v26 = vld [vmem:[%s2108_s11 + $0x10] sm:$0xff]   ;;  %v1913_v28 = vld [vmem:[%s2108_s11 + $0x38] sm:$0xff]   ;;  %v1083_v32 = vshll.u32 %v1918_v24, 16  ;;  %v547_v35 = vshrl.u32 %v1916_v19, 16 }
  0x22   : > { %v540_v25 = vrot.slane %v538_v21, 1  ;;  %v1076_v30 = vshrl.u32 %v1917_v23, 16  ;;  %v1078_v31 = vshll.u32 %v1917_v23, 16  ;;  %v1914_v33 = vld [vmem:[%s2108_s11 + $0x40] sm:$0xff]   ;;  %v551_v38 = vshll.u32 %v1919_v26, 16  ;;  %v1921_v39 = vld [vmem:[%s2108_s11 + $0x18] sm:$0xff]  }
  0x23   : > { %v545_v29 = vrot.slane %v543_v22, 1  ;;  %v1085_v37 = vrot.slane %v1083_v32, 1  ;;  %v1087_v40 = vshrl.u32 %v1918_v24, 16  ;;  %v1091_v41 = vshll.u32 %v1920_v27, 16  ;;  %v1922_v46 = vld [vmem:[%s2108_s11 + $0x20] sm:$0xff]   ;;  %v1924_v54 = vld [vmem:[%s2108_s11 + $0x28] sm:$0xff]  }
  0x24   : > { %v541_v34 = vor.u32 %v540_v25, %v536_v20  ;;  %v1080_v36 = vrot.slane %v1078_v31, 1  ;;  %v555_v44 = vshrl.u32 %v1919_v26, 16  ;;  %v559_v45 = vshll.u32 %v1921_v39, 16  ;;  %v1923_v50 = vld [vmem:[%s2108_s11 + $0x20] sm:$0xff]   ;;  %v1925_v58 = vld [vmem:[%s2108_s11 + $0x28] sm:$0xff]   ;;  %v1926_v61 = vld [vmem:[%s2108_s11 + $0x30] sm:$0xff]  }
  0x25   : > { %1708 = vmatmul.mubr.msk.bf16.gmra.mrb[4].mxu1 %vm301_vm0, %v1905_v10  ;;  %1744 = vmatmul.mubr.msk.bf16.gmra.mrb[4].mxu0 %vm301_vm0, %v1906_v11  ;;  %v1095_v47 = vshrl.u32 %v1920_v27, 16  ;;  %v553_v49 = vrot.slane %v551_v38, 1  ;;  %v549_v51 = vor.u32 %v547_v35, %v545_v29  ;;  %v1093_v52 = vrot.slane %v1091_v41, 1  ;;  %v1927_v11 = vld [vmem:[%s2108_s11 + $0x30] sm:$0xff]   ;;  %v1929_v18 = vld [vmem:[%s2108_s11 + $0x38] sm:$0xff]   ;;  %v1930_v21 = vld [vmem:[%s2108_s11 + $0x40] sm:$0xff]  }
  0x26   : > { %1711 = vmatprep.mubr.msk.bf16.mxu1 %vm301_vm0, %v1907_v12  ;;  %1747 = vmatprep.mubr.msk.bf16.mxu0 %vm301_vm0, %v1908_v13  ;;  %v546_v42 = vsel %vm534_vm1, %v541_v34, %v545_v29  ;;  %v1081_v43 = vor.u32 %v1080_v36, %v1076_v30  ;;  %v1099_v53 = vshll.u32 %v1922_v46, 16  ;;  %v1089_v55 = vor.u32 %v1087_v40, %v1085_v37  ;;  %v1932_v41 = vld [vmem:[%s2108_s11 + $0x48] ss:$0 sps:$4 sm:$0x11]  }
  0x27   : > { %v557_v56 = vor.u32 %v555_v44, %v553_v49  ;;  %v561_v57 = vrot.slane %v559_v45, 1  ;;  %v1097_v59 = vor.u32 %v1095_v47, %v1093_v52  ;;  %v563_v62 = vshrl.u32 %v1921_v39, 16 }
  0x28   : > { %v1086_v48 = vsel %vm534_vm1, %v1081_v43, %v1085_v37  ;;  %v1101_v60 = vrot.slane %v1099_v53, 1  ;;  %v567_v63 = vshll.u32 %v1923_v50, 16  ;;  %v554_v0 = vsel %vm534_vm1, %v549_v51, %v553_v49  ;;  %v1931_v37 = vld [vmem:[%s2108_s11 + $0x40] ss:$0 sps:$4 sm:$0x11]  }
  0x29   : > { %v1103_v1 = vshrl.u32 %v1922_v46, 16  ;;  %v1107_v2 = vshll.u32 %v1924_v54, 16  ;;  %v1094_v3 = vsel %vm534_vm1, %v1089_v55, %v1093_v52  ;;  %v562_v4 = vsel %vm534_vm1, %v557_v56, %v561_v57 }
  0x2a   : > { %v571_v5 = vshrl.u32 %v1923_v50, 16  ;;  %v575_v6 = vshll.u32 %v1925_v58, 16  ;;  %v1102_v7 = vsel %vm534_vm1, %v1097_v59, %v1101_v60  ;;  %v1111_v8 = vshrl.u32 %v1924_v54, 16 }
  0x2b   : > { %v1115_v9 = vshll.u32 %v1926_v61, 16  ;;  %v569_v10 = vrot.slane %v567_v63, 1  ;;  %v565_v12 = vor.u32 %v563_v62, %v561_v57  ;;  %v1105_v13 = vor.u32 %v1103_v1, %v1101_v60 }
  0x2c   : > { %v583_v22 = vshll.u32 %v1927_v11, 16  ;;  %v579_v25 = vshrl.u32 %v1925_v58, 16  ;;  %v587_v29 = vshrl.u32 %v1927_v11, 16  ;;  %v591_v30 = vshll.u32 %v1929_v18, 16  ;;  %v2195_v58 = vld [vmem:[%s2285_s2] ss:$0 sm:$0xff] }
  0x2d   : > { %1712 = vmatmul.mubr.msk.bf16.gmra.mrb[8].mxu1 %vm301_vm0, %v1909_v14  ;;  %1748 = vmatmul.mubr.msk.bf16.gmra.mrb[8].mxu0 %vm301_vm0, %v1910_v15  ;;  %v1109_v14 = vrot.slane %v1107_v2, 1  ;;  %v1928_v15 = vld [vmem:[%s2108_s11 + $0x38] sm:$0xff]   ;;  %v1117_v20 = vrot.slane %v1115_v9, 1  ;;  %v570_v23 = vsel %vm534_vm1, %v565_v12, %v569_v10  ;;  %v595_v45 = vshrl.u32 %v1929_v18, 16 }
  0x2e   : > { %1715 = vmatprep.mubr.msk.bf16.mxu1 %vm301_vm0, %v1911_v16  ;;  %1751 = vmatprep.mubr.msk.bf16.mxu0 %vm301_vm0, %v1912_v17  ;;  %v573_v16 = vor.u32 %v571_v5, %v569_v10  ;;  %v577_v17 = vrot.slane %v575_v6, 1  ;;  %v1123_v26 = vshll.u32 %v1928_v15, 16  ;;  %v1127_v32 = vshrl.u32 %v1928_v15, 16 }
  0x2f   : > { %v1113_v19 = vor.u32 %v1111_v8, %v1109_v14  ;;  %v1110_v24 = vsel %vm534_vm1, %v1105_v13, %v1109_v14  ;;  %v585_v34 = vrot.slane %v583_v22, 1  ;;  %v593_v40 = vrot.slane %v591_v30, 1 }
  0x30   : > { %v578_v27 = vsel %vm534_vm1, %v573_v16, %v577_v17  ;;  %v581_v35 = vor.u32 %v579_v25, %v577_v17  ;;  %v1125_v36 = vrot.slane %v1123_v26, 1  ;;  %v599_v46 = vshll.u32 %v1931_v37, 16 }
  0x31   : > { %v1118_v31 = vsel %vm534_vm1, %v1113_v19, %v1117_v20  ;;  %v589_v39 = vor.u32 %v587_v29, %v585_v34  ;;  %v1135_v49 = vshrl.u32 %v1930_v21, 16  ;;  %v1139_v50 = vshll.u32 %v1932_v41, 16 }
  0x32   : > { %v586_v44 = vsel %vm534_vm1, %v581_v35, %v585_v34  ;;  %v597_v52 = vor.u32 %v595_v45, %v593_v40  ;;  %v601_v53 = vrot.slane %v599_v46, 1 }
  0x33   : > { %v1141_v55 = vrot.slane %v1139_v50, 1 }
  0x34   : > { %v602_v56 = vsel %vm534_vm1, %v597_v52, %v601_v53 }
  0x35   : > { %1716 = vmatmul.mubr.msk.bf16.gmra.mrb[12].mxu1 %vm301_vm0, %v1913_v28  ;;  %1752 = vmatmul.mubr.msk.bf16.gmra.mrb[12].mxu0 %vm301_vm0, %v1914_v33  ;;  %v1119_v28 = vshrl.u32 %v1926_v61, 16  ;;  %v1131_v33 = vshll.u32 %v1930_v21, 16 }
  0x36   : > { %1721 = vmatprep.mubr.msk.bf16.mxu1 %vm301_vm0, %v546_v42  ;;  %1757 = vmatprep.mubr.msk.bf16.mxu0 %vm301_vm0, %v1086_v48  ;;  %v1129_v42 = vor.u32 %v1127_v32, %v1125_v36  ;;  %v594_v48 = vsel %vm534_vm1, %v589_v39, %v593_v40 }
  0x37   : > { %v1121_v38 = vor.u32 %v1119_v28, %v1117_v20  ;;  %v1133_v43 = vrot.slane %v1131_v33, 1 }
  0x39   : > { %v1126_v47 = vsel %vm534_vm1, %v1121_v38, %v1125_v36  ;;  %v1134_v51 = vsel %vm534_vm1, %v1129_v42, %v1133_v43  ;;  %v1137_v54 = vor.u32 %v1135_v49, %v1133_v43 }
  0x3b   : > { %v1142_v57 = vsel %vm534_vm1, %v1137_v54, %v1141_v55 }
  0x3d   : > { %1722 = vmatmul.mubr.msk.bf16.vlgmr.msra.gmra.mrb[0].mxu1 %vm301_vm0, %v554_v0  ;;  %1758 = vmatmul.mubr.msk.bf16.vlgmr.msra.gmra.mrb[0].mxu0 %vm301_vm0, %v1094_v3 }
  0x3e   : > { %1725 = vmatprep.mubr.msk.bf16.mxu1 %vm301_vm0, %v562_v4  ;;  %1761 = vmatprep.mubr.msk.bf16.mxu0 %vm301_vm0, %v1102_v7 }
  0x45   : > { %1726 = vmatmul.mubr.msk.bf16.gmra.mrb[4].mxu1 %vm301_vm0, %v570_v23  ;;  %1762 = vmatmul.mubr.msk.bf16.gmra.mrb[4].mxu0 %vm301_vm0, %v1110_v24 }
  0x46   : > { %1729 = vmatprep.mubr.msk.bf16.mxu1 %vm301_vm0, %v578_v27  ;;  %1765 = vmatprep.mubr.msk.bf16.mxu0 %vm301_vm0, %v1118_v31 }
  0x4d   : > { %1730 = vmatmul.mubr.msk.bf16.gmra.mrb[8].mxu1 %vm301_vm0, %v586_v44  ;;  %1766 = vmatmul.mubr.msk.bf16.gmra.mrb[8].mxu0 %vm301_vm0, %v1126_v47 }
  0x4e   : > { %1733 = vmatprep.mubr.msk.bf16.mxu1 %vm301_vm0, %v594_v48  ;;  %1769 = vmatprep.mubr.msk.bf16.mxu0 %vm301_vm0, %v1134_v51 }
  0x55   : > { %1734 = vmatmul.mubr.msk.bf16.gmra.mrb[12].mxu1 %vm301_vm0, %v602_v56  ;;  %1770 = vmatmul.mubr.msk.bf16.gmra.mrb[12].mxu0 %vm301_vm0, %v1142_v57 }
 0x110   : > { %v1723_v59 = vpop.f32.mrb[0].mxu1  ;;  %v1759_v61 = vpop.f32.mrb[0].mxu0 }
 0x111   : > { %v1773_v60 = vadd.f32 %v1723_v59, %v2195_v58  ;;  %v667_v62 = vpop.f32.mrb[1].mxu1  ;;  %v1207_v0 = vpop.f32.mrb[1].mxu0 }
 0x112   : > { %v1775_v63 = vadd.f32 %v2195_v58, %v667_v62  ;;  %v1724_v1 = vpop.f32.mrb[2].mxu1  ;;  %v1760_v4 = vpop.f32.mrb[2].mxu0 }
 0x113   : > { %v1774_v2 = vadd.f32 %v1773_v60, %v1759_v61  ;;  %v1777_v3 = vadd.f32 %v1724_v1, %v2195_v58  ;;  %v670_v5 = vpop.f32.mrb[3].mxu1  ;;  %v1210_v8 = vpop.f32.mrb[3].mxu0 }
 0x114   : > { %v1776_v6 = vadd.f32 %v1775_v63, %v1207_v0  ;;  %v1779_v7 = vadd.f32 %v2195_v58, %v670_v5 }
 0x115   : > { %v1778_v9 = vadd.f32 %v1777_v3, %v1760_v4 }
 0x116   : > { %v1780_v10 = vadd.f32 %v1779_v7, %v1210_v8 }
 0x117   : > { %v1626_v11 = vpack.c.bf16 %v1778_v9, %v1774_v2 }
 0x118   : > { %v1621_v12 = vpack.c.bf16 %v1780_v10, %v1776_v6  ;;  %v1727_v13 = vpop.f32.mrb[4].mxu1  ;;  %v1763_v15 = vpop.f32.mrb[4].mxu0 }
 0x119   : > { %1658 = vst [vmem:[%s2204_s26 + $0x8] sm:$0xff] %v1626_v11   ;;  %v1781_v14 = vadd.f32 %v1727_v13, %v2195_v58  ;;  %v683_v16 = vpop.f32.mrb[5].mxu1  ;;  %v1223_v18 = vpop.f32.mrb[5].mxu0 }
 0x11a   : > { %1622 = vst [vmem:[%s2204_s26] sm:$0xff] %v1621_v12   ;;  %v1783_v17 = vadd.f32 %v2195_v58, %v683_v16  ;;  %v1728_v19 = vpop.f32.mrb[6].mxu1  ;;  %v1764_v22 = vpop.f32.mrb[6].mxu0 }
 0x11b   : > { %v1782_v20 = vadd.f32 %v1781_v14, %v1763_v15  ;;  %v1785_v21 = vadd.f32 %v1728_v19, %v2195_v58  ;;  %v686_v23 = vpop.f32.mrb[7].mxu1  ;;  %v1226_v26 = vpop.f32.mrb[7].mxu0 }
 0x11c   : > { %v1784_v24 = vadd.f32 %v1783_v17, %v1223_v18  ;;  %v1787_v25 = vadd.f32 %v2195_v58, %v686_v23 }
 0x11d   : > { %v1786_v27 = vadd.f32 %v1785_v21, %v1764_v22 }
 0x11e   : > { %v1788_v28 = vadd.f32 %v1787_v25, %v1226_v26 }
 0x11f   : > { %v1636_v29 = vpack.c.bf16 %v1786_v27, %v1782_v20 }
 0x120   : > { %v1631_v30 = vpack.c.bf16 %v1788_v28, %v1784_v24  ;;  %v1731_v31 = vpop.f32.mrb[8].mxu1  ;;  %v1767_v33 = vpop.f32.mrb[8].mxu0 }
 0x121   : > { %1660 = vst [vmem:[%s2204_s26 + $0x18] sm:$0xff] %v1636_v29   ;;  %v1789_v32 = vadd.f32 %v1731_v31, %v2195_v58  ;;  %v699_v34 = vpop.f32.mrb[9].mxu1  ;;  %v1239_v36 = vpop.f32.mrb[9].mxu0 }
 0x122   : > { %1659 = vst [vmem:[%s2204_s26 + $0x10] sm:$0xff] %v1631_v30   ;;  %v1791_v35 = vadd.f32 %v2195_v58, %v699_v34  ;;  %v1732_v37 = vpop.f32.mrb[10].mxu1  ;;  %v1768_v40 = vpop.f32.mrb[10].mxu0 }
 0x123   : > { %v1790_v38 = vadd.f32 %v1789_v32, %v1767_v33  ;;  %v1793_v39 = vadd.f32 %v1732_v37, %v2195_v58  ;;  %v702_v41 = vpop.f32.mrb[11].mxu1  ;;  %v1242_v44 = vpop.f32.mrb[11].mxu0 }
 0x124   : > { %v1792_v42 = vadd.f32 %v1791_v35, %v1239_v36  ;;  %v1795_v43 = vadd.f32 %v2195_v58, %v702_v41 }
 0x125   : > { %v1794_v45 = vadd.f32 %v1793_v39, %v1768_v40 }
 0x126   : > { %v1796_v46 = vadd.f32 %v1795_v43, %v1242_v44 }
 0x127   : > { %v1646_v47 = vpack.c.bf16 %v1794_v45, %v1790_v38 }
 0x128   : > { %v1641_v48 = vpack.c.bf16 %v1796_v46, %v1792_v42  ;;  %v1735_v49 = vpop.f32.mrb[12].mxu1  ;;  %v1771_v51 = vpop.f32.mrb[12].mxu0 }
 0x129   : > { %1662 = vst [vmem:[%s2204_s26 + $0x28] sm:$0xff] %v1646_v47   ;;  %v1797_v50 = vadd.f32 %v1735_v49, %v2195_v58  ;;  %v715_v52 = vpop.f32.mrb[13].mxu1  ;;  %v1255_v54 = vpop.f32.mrb[13].mxu0 }
 0x12a   : > { %1661 = vst [vmem:[%s2204_s26 + $0x20] sm:$0xff] %v1641_v48   ;;  %v1799_v53 = vadd.f32 %v2195_v58, %v715_v52  ;;  %v1736_v55 = vpop.f32.mrb[14].mxu1  ;;  %v1772_v59 = vpop.f32.mrb[14].mxu0 }
 0x12b   : > { %v1798_v56 = vadd.f32 %v1797_v50, %v1771_v51  ;;  %v1801_v57 = vadd.f32 %v1736_v55, %v2195_v58  ;;  %v718_v60 = vpop.f32.mrb[15].mxu1  ;;  %v1258_v63 = vpop.f32.mrb[15].mxu0 }
 0x12c   : > { %v1800_v61 = vadd.f32 %v1799_v53, %v1255_v54  ;;  %v1803_v62 = vadd.f32 %v2195_v58, %v718_v60 }
 0x12d   : > { %v1802_v0 = vadd.f32 %v1801_v57, %v1772_v59 }
 0x12e   : > { %v1804_v1 = vadd.f32 %v1803_v62, %v1258_v63 }
 0x12f   : > { %v1656_v2 = vpack.c.bf16 %v1802_v0, %v1798_v56 }
 0x130   : > { %v1651_v3 = vpack.c.bf16 %v1804_v1, %v1800_v61 }
 0x131   : > { %1664 = vst [vmem:[%s2204_s26 + $0x38] sm:$0xff] %v1656_v2  }
 0x132   : > { %1663 = vst [vmem:[%s2204_s26 + $0x30] sm:$0xff] %v1651_v3  }
 0x133   : > { %1946 = shalt.err (!%p1943_p5)
}
 0x134   : > { %s1947_s9 = scalar_lea.hbm %s2229_s4, 1024  ;;  %s1951_s18 = scalar_lea.hbm %s2286_s3, 2048 }
 0x135   : > { %p1948_p6 = scmp.ne.s32.totalorder %s2229_s4, %s1947_s9  ;;  %p1952_p10 = scmp.lt.u32.totalorder %s2229_s4, %s2286_s3 }
 0x136   : > { %p1953_p11 = scmp.lt.u32.totalorder %s1951_s18, %s1947_s9  ;;  %p1955_p13 = scmp.lt.u32.totalorder %s1947_s9, %s2229_s4 }
 0x137   : > { %p1949_p7 = pnand %p1948_p6, %p2076_p4 }
 0x138   : > { %p1954_p12 = por %p1953_p11, %p1952_p10 }
 0x139   : > { %p1950_p9 = pneg %p1949_p7 }
 0x13a   : > { %p1956_p0 = por %p1955_p13, %p1954_p12 }
 0x13c   : > { %p1957_p1 = pnand %p1956_p0, %p1950_p9 }
 0x13e   : > { %1960 = shalt.err (!%p1957_p1)
}
 0x13f   : > { %s2014_s23 = smov 64   ;;  %s2015_s26 = smov 4  }
 0x140   : > { %1838 = dma.vmem_to_hbm [thread:$0]  (%p2076_p4), %s2231_s28, 1024, %s2229_s4, %s2237_s5, %s2014_s23, %s2014_s23, %s2015_s26  }
 0x141 PF: > { %p1844_p2 = scmp.ge.s32.totalorder %s2011_s17, 2  ;;  %s1429_s27 = sand.u32 1, %s1991_s12  }
 0x142   : > { %s1430_s29 = scalar_lea.sflag [#allocation4], %s1429_s27 }
 0x143   : > { %p1841_p3 = pnand %p1844_p2, %p2083_p8 }
 0x145   : > { %1986 = dma.done.wait (!%p1841_p3), %s1430_s29, 1024  }
 0x146   : > { %1988 = vsyncadd (!%p1841_p3), %s1430_s29, 4294966272  ;;  %s16_s17 = sadd.s32 1, %s2011_s17   ;;  %s2289_s12 = smov %s1995_s13 }
 0x147   : > { %p13_p5 = scmp.ge.s32.totalorder %s16_s17, 4   ;;  %s2290_s13 = smov %s1999_s14 }
 0x148   : > { %s2291_s14 = smov %s2089_s25  ;;  %s2292_s15 = smov %s2007_s16 }
 0x149   : > { %s2293_s16 = smov %s2295_s20  ;;  %15 = sbr.rel (!%p13_p5) target bundleno = 4 (0x4), region = 70 }
 0x150   :  { %1435 = vsyncpa [#allocation4], 1 }
 0x151   :  { %1437 = vsyncpa [#allocation4 + $0x1], 1 }

</bundles_post_ra>
